<compile_context>
chip_gen: v7x
topology: tpu7x:2x2x1
jax: 0.10.0
libtpu: 0.0.40
codegen_flags: <defaults>
</compile_context>

<pallas_src>
import jax
import jax.numpy as jnp
from jax.experimental import pallas as pl
from jax.experimental.pallas import tpu as pltpu


def malware_nn_kernel(x_ref, w1_ref, b1_ref, w2_ref, b2_ref, w3_ref, b3_ref,
                      o_ref):
    x = x_ref[...]
    # fc1 + ReLU (MXU)
    h1 = jnp.dot(x, w1_ref[...], preferred_element_type=jnp.float32)
    h1 = jnp.maximum(h1 + b1_ref[...], 0.0)
    # fc2 + ReLU (MXU)
    h2 = jnp.dot(h1, w2_ref[...], preferred_element_type=jnp.float32)
    h2 = jnp.maximum(h2 + b2_ref[...], 0.0)
    # fc3 (64 -> 1): VPU multiply + lane reduction. w3_ref is (1, 64),
    # b3_ref is (1, 1).
    z = jnp.sum(h2 * w3_ref[...], axis=-1, keepdims=True) + b3_ref[...]
    # Sigmoid: exp and approximate reciprocal both run on the EUP slot.
    o_ref[...] = pl.reciprocal(1.0 + jnp.exp(-z), approx=True)


def _pick_batch_tile(batch, input_dim):
    """Pick the batch tile: whole batch if small, else a large multiple-of-8
    tile that keeps the double-buffered x block comfortably inside scoped
    VMEM (target <= ~8 MiB for the x stream)."""
    if batch <= 1024:
        return batch
    bytes_per_row = input_dim * 4  # f32
    max_rows = (8 * 1024 * 1024) // (2 * bytes_per_row)
    tb = min(1024, max(8, (max_rows // 8) * 8))
    return tb


def malware_nn_forward(x, prepped_params, *, tb=None):
    """x: [B, D] float32. prepped_params from prep_params().
    Returns [B, 1] float32 sigmoid probabilities."""
    w1, b1, w2, b2, w3_row, b3 = prepped_params
    B, D = x.shape

    if tb is None:
        tb = _pick_batch_tile(B, D)

    grid = (pl.cdiv(B, tb),)
    const = lambda i: (0, 0)  # weights/biases: single block, VMEM-resident

    return pl.pallas_call(
        malware_nn_kernel,
        out_shape=jax.ShapeDtypeStruct((B, 1), jnp.float32),
        grid=grid,
        in_specs=[
            pl.BlockSpec((tb, D), lambda i: (i, 0)),      # x: streamed over B
            pl.BlockSpec(w1.shape, const),                # w1 [D, 128]
            pl.BlockSpec(b1.shape, const),                # b1 [1, 128]
            pl.BlockSpec(w2.shape, const),                # w2 [128, 64]
            pl.BlockSpec(b2.shape, const),                # b2 [1, 64]
            pl.BlockSpec(w3_row.shape, const),            # w3 [1, 64]
            pl.BlockSpec(b3.shape, const),                # b3 [1, 1]
        ],
        out_specs=pl.BlockSpec((tb, 1), lambda i: (i, 0)),
        compiler_params=pltpu.CompilerParams(
            dimension_semantics=("parallel",),
            vmem_limit_bytes=32 * 1024 * 1024,
        ),
    )(x, w1, b1, w2, b2, w3_row, b3)


def init_params(input_dim, key):
    """Deterministic init mimicking PyTorch nn.Linear default
    (uniform(-1/sqrt(fan_in), 1/sqrt(fan_in))). Weights stored as [in, out]."""
    dims = [(input_dim, 128), (128, 64), (64, 1)]
    keys = jax.random.split(key, 2 * len(dims))
    params = []
    for i, (fan_in, fan_out) in enumerate(dims):
        bound = 1.0 / (fan_in ** 0.5)
        w = jax.random.uniform(keys[2 * i], (fan_in, fan_out),
                               jnp.float32, -bound, bound)
        b = jax.random.uniform(keys[2 * i + 1], (fan_out,),
                               jnp.float32, -bound, bound)
        params += [w, b]
    return tuple(params)


def prep_params(params):
    """One-time layout prep (hoisted out of the forward path): biases as
    (1, out) rows, fc3 weight as a (1, 64) row for the lane reduction."""
    w1, b1, w2, b2, w3, b3 = params
    return (
        w1,                              # [D, 128]
        b1.reshape(1, -1),               # [1, 128]
        w2,                              # [128, 64]
        b2.reshape(1, -1),               # [1, 64]
        w3.reshape(1, -1),               # [1, 64]  (was [64, 1])
        b3.reshape(1, 1),                # [1, 1]
    )


def reference_forward(x, params):
    w1, b1, w2, b2, w3, b3 = params
    h1 = jnp.maximum(x @ w1 + b1, 0.0)
    h2 = jnp.maximum(h1 @ w2 + b2, 0.0)
    return jax.nn.sigmoid(h2 @ w3 + b3)


if __name__ == "__main__":
    key = jax.random.PRNGKey(0)
    k_x, k_p = jax.random.split(key)

    BATCH = 8
    INPUT_DIM = 32

    x = jax.random.normal(k_x, (BATCH, INPUT_DIM), jnp.float32)
    params = init_params(INPUT_DIM, k_p)
    prepped = prep_params(params)

    out = malware_nn_forward(x, prepped)
    out = jax.block_until_ready(out)

    ref = reference_forward(x, params)
    assert out.shape == (BATCH, 1)
    # Tolerance accounts for the EUP approximate reciprocal in the sigmoid.
    assert jnp.allclose(out, ref, atol=2e-3, rtol=2e-3), "mismatch vs reference"

    print("KERNEL_OK")
</pallas_src>

<mosaic_0001>
module attributes {stable_mosaic.version = 11 : i64} {
  func.func @malware_nn_kernel(%arg0: i32, %arg1: memref<8x32xf32, #tpu.memory_space<vmem>>, %arg2: memref<32x128xf32, #tpu.memory_space<vmem>>, %arg3: memref<1x128xf32, #tpu.memory_space<vmem>>, %arg4: memref<128x64xf32, #tpu.memory_space<vmem>>, %arg5: memref<1x64xf32, #tpu.memory_space<vmem>>, %arg6: memref<1x64xf32, #tpu.memory_space<vmem>>, %arg7: memref<1x1xf32, #tpu.memory_space<vmem>>, %arg8: memref<8x1xf32, #tpu.memory_space<vmem>>) attributes {dimension_semantics = [#tpu.dimension_semantics<parallel>], iteration_bounds = array<i64: 1>, scalar_prefetch = 0 : i64, scratch_operands = 0 : i64, tpu.core_type = #tpu.core_type<tc>, window_params = [{transform_indices = @transform_0, window_bounds = array<i64: 8, 32>}, {pipeline_mode = #tpu.pipeline_mode<synchronous>, transform_indices = @transform_1, window_bounds = array<i64: 32, 128>}, {pipeline_mode = #tpu.pipeline_mode<synchronous>, transform_indices = @transform_2, window_bounds = array<i64: 1, 128>}, {pipeline_mode = #tpu.pipeline_mode<synchronous>, transform_indices = @transform_3, window_bounds = array<i64: 128, 64>}, {pipeline_mode = #tpu.pipeline_mode<synchronous>, transform_indices = @transform_4, window_bounds = array<i64: 1, 64>}, {pipeline_mode = #tpu.pipeline_mode<synchronous>, transform_indices = @transform_5, window_bounds = array<i64: 1, 64>}, {pipeline_mode = #tpu.pipeline_mode<synchronous>, transform_indices = @transform_6, window_bounds = array<i64: 1, 1>}, {transform_indices = @transform_7, window_bounds = array<i64: 8, 1>}]} {
    %c0 = arith.constant 0 : index
    %c0_0 = arith.constant 0 : index
    %0 = vector.load %arg1[%c0, %c0_0] : memref<8x32xf32, #tpu.memory_space<vmem>>, vector<8x32xf32>
    %c0_1 = arith.constant 0 : index
    %c0_2 = arith.constant 0 : index
    %1 = vector.load %arg2[%c0_1, %c0_2] : memref<32x128xf32, #tpu.memory_space<vmem>>, vector<32x128xf32>
    %cst = arith.constant dense<0.000000e+00> : vector<8x128xf32>
    %2 = tpu.matmul %0, %1, %cst {dimension_numbers = #tpu.dot_dimension_numbers<[1], [0], [0], [1], [0, 0, 1, 1], [], []>} : vector<8x32xf32>, vector<32x128xf32>, vector<8x128xf32> -> vector<8x128xf32>
    %c0_3 = arith.constant 0 : index
    %c0_4 = arith.constant 0 : index
    %3 = vector.load %arg3[%c0_3, %c0_4] : memref<1x128xf32, #tpu.memory_space<vmem>>, vector<1x128xf32>
    %4 = vector.broadcast %3 : vector<1x128xf32> to vector<8x128xf32>
    %5 = arith.addf %2, %4 : vector<8x128xf32>
    %cst_5 = arith.constant 0.000000e+00 : f32
    %6 = vector.broadcast %cst_5 : f32 to vector<8x128xf32>
    %7 = arith.maximumf %5, %6 : vector<8x128xf32>
    %c0_6 = arith.constant 0 : index
    %c0_7 = arith.constant 0 : index
    %8 = vector.load %arg4[%c0_6, %c0_7] : memref<128x64xf32, #tpu.memory_space<vmem>>, vector<128x64xf32>
    %cst_8 = arith.constant dense<0.000000e+00> : vector<8x64xf32>
    %9 = tpu.matmul %7, %8, %cst_8 {dimension_numbers = #tpu.dot_dimension_numbers<[1], [0], [0], [1], [0, 0, 1, 1], [], []>} : vector<8x128xf32>, vector<128x64xf32>, vector<8x64xf32> -> vector<8x64xf32>
    %c0_9 = arith.constant 0 : index
    %c0_10 = arith.constant 0 : index
    %10 = vector.load %arg5[%c0_9, %c0_10] : memref<1x64xf32, #tpu.memory_space<vmem>>, vector<1x64xf32>
    %11 = vector.broadcast %10 : vector<1x64xf32> to vector<8x64xf32>
    %12 = arith.addf %9, %11 : vector<8x64xf32>
    %cst_11 = arith.constant 0.000000e+00 : f32
    %13 = vector.broadcast %cst_11 : f32 to vector<8x64xf32>
    %14 = arith.maximumf %12, %13 : vector<8x64xf32>
    %c0_12 = arith.constant 0 : index
    %c0_13 = arith.constant 0 : index
    %15 = vector.load %arg6[%c0_12, %c0_13] : memref<1x64xf32, #tpu.memory_space<vmem>>, vector<1x64xf32>
    %16 = vector.broadcast %15 : vector<1x64xf32> to vector<8x64xf32>
    %17 = arith.mulf %14, %16 : vector<8x64xf32>
    %cst_14 = arith.constant dense<0.000000e+00> : vector<8xf32>
    %18 = vector.multi_reduction <add>, %17, %cst_14 [1] : vector<8x64xf32> to vector<8xf32>
    %19 = vector.shape_cast %18 : vector<8xf32> to vector<8x1xf32>
    %c0_15 = arith.constant 0 : index
    %c0_16 = arith.constant 0 : index
    %20 = vector.load %arg7[%c0_15, %c0_16] : memref<1x1xf32, #tpu.memory_space<vmem>>, vector<1x1xf32>
    %21 = vector.broadcast %20 : vector<1x1xf32> to vector<8x1xf32>
    %22 = arith.addf %19, %21 : vector<8x1xf32>
    %cst_17 = arith.constant 0.000000e+00 : f32
    %23 = vector.broadcast %cst_17 : f32 to vector<8x1xf32>
    %24 = arith.subf %23, %22 : vector<8x1xf32>
    %25 = math.exp %24 : vector<8x1xf32>
    %cst_18 = arith.constant 1.000000e+00 : f32
    %26 = vector.broadcast %cst_18 : f32 to vector<8x1xf32>
    %27 = arith.addf %26, %25 : vector<8x1xf32>
    %28 = tpu.reciprocal %27 {approx = true} : vector<8x1xf32> -> vector<8x1xf32>
    %c0_19 = arith.constant 0 : index
    %c0_20 = arith.constant 0 : index
    %29 = vector.load %arg8[%c0_19, %c0_20] : memref<8x1xf32, #tpu.memory_space<vmem>>, vector<8x1xf32>
    tpu.vector_store %arg8[%c0_19, %c0_20], %28 {strides = array<i32>} : memref<8x1xf32, #tpu.memory_space<vmem>>, vector<8x1xf32>,
    return
  }
  func.func @transform_0(%arg0: i32) -> (i32, i32) {
    %c0_i32 = arith.constant 0 : i32
    %c0_i32_0 = arith.constant 0 : i32
    return %arg0, %c0_i32 : i32, i32
  }
  func.func @transform_1(%arg0: i32) -> (i32, i32) {
    %c0_i32 = arith.constant 0 : i32
    %c0_i32_0 = arith.constant 0 : i32
    %c0_i32_1 = arith.constant 0 : i32
    return %c0_i32, %c0_i32_0 : i32, i32
  }
  func.func @transform_2(%arg0: i32) -> (i32, i32) {
    %c0_i32 = arith.constant 0 : i32
    %c0_i32_0 = arith.constant 0 : i32
    %c0_i32_1 = arith.constant 0 : i32
    return %c0_i32, %c0_i32_0 : i32, i32
  }
  func.func @transform_3(%arg0: i32) -> (i32, i32) {
    %c0_i32 = arith.constant 0 : i32
    %c0_i32_0 = arith.constant 0 : i32
    %c0_i32_1 = arith.constant 0 : i32
    return %c0_i32, %c0_i32_0 : i32, i32
  }
  func.func @transform_4(%arg0: i32) -> (i32, i32) {
    %c0_i32 = arith.constant 0 : i32
    %c0_i32_0 = arith.constant 0 : i32
    %c0_i32_1 = arith.constant 0 : i32
    return %c0_i32, %c0_i32_0 : i32, i32
  }
  func.func @transform_5(%arg0: i32) -> (i32, i32) {
    %c0_i32 = arith.constant 0 : i32
    %c0_i32_0 = arith.constant 0 : i32
    %c0_i32_1 = arith.constant 0 : i32
    return %c0_i32, %c0_i32_0 : i32, i32
  }
  func.func @transform_6(%arg0: i32) -> (i32, i32) {
    %c0_i32 = arith.constant 0 : i32
    %c0_i32_0 = arith.constant 0 : i32
    %c0_i32_1 = arith.constant 0 : i32
    return %c0_i32, %c0_i32_0 : i32, i32
  }
  func.func @transform_7(%arg0: i32) -> (i32, i32) {
    %c0_i32 = arith.constant 0 : i32
    %c0_i32_0 = arith.constant 0 : i32
    return %arg0, %c0_i32 : i32, i32
  }
}

</mosaic_0001>

<bundles_post_ra>
// kernel: tpu_custom_call.1
= control target key start
LH: loop header
LB: loop body
LE: loop exit
PB: predicated region body
PF: predicated region fallthrough
CT: control target
= control target key end

     0   :  { %v350_v0 = vmov 0.0|0.0   ;;  %vm351_vm0 = vmmov 0   ;;  %v352_v4 = vmov 0.0   ;;  %vm40_vm1 = vcmask 261120   ;;  %s471_s1 = inlined_call_operand.vmem [shape: f32[32,128], index: 1, kind: input, shape index: {}]   ;;  %s472_s3 = inlined_call_operand.vmem [shape: f32[128,64], index: 3, kind: input, shape index: {}]   ;;  %s473_s0 = inlined_call_operand.vmem [shape: f32[8,32], index: 0, kind: input, shape index: {}]   ;;  %s474_s2 = inlined_call_operand.vmem [shape: f32[1,128], index: 2, kind: input, shape index: {}]   ;;  %s475_s6 = inlined_call_operand.<no memory space> [shape: f32[1,1], index: 6, kind: input, shape index: {}]   ;;  %s476_s4 = inlined_call_operand.vmem [shape: f32[1,64], index: 4, kind: input, shape index: {}]   ;;  %s477_s5 = inlined_call_operand.vmem [shape: f32[1,64], index: 5, kind: input, shape index: {}]   ;;  %s478_s7 = inlined_call_operand.vmem [shape: f32[8,1], index: 7, kind: output, shape index: {}]  }
   0x1   :  { %313 = vmatprep.subr.bf16.mxu0 %v350_v0  ;;  %v29_v1 = vld [vmem:[%s471_s1] sm:$0xff]  ;;  %v30_v2 = vld [vmem:[%s471_s1 + $0x8] sm:$0xff]  ;;  %v31_v3 = vld [vmem:[%s471_s1 + $0x10] sm:$0xff]  ;;  %275 = vmatprep.mubr.msk.f32.mxu0 %vm351_vm0, %v352_v4  ;;  %v12_v38 = vstv %s475_s6  ;;  %vm217_vm2 = vcmask 523264   ;;  %vm234_vm3 = vcmask 7168  }
   0x2   :  { %v314_v5 = vpack.c.bf16 %v30_v2, %v29_v1  ;;  %v32_v6 = vld [vmem:[%s471_s1 + $0x18] sm:$0xff]  ;;  %319 = vmatprep.subr.bf16.mxu1 %v350_v0  ;;  %v115_v7 = vld [vmem:[%s472_s3] sm:$0xff]  ;;  %310 = vmatprep.mubr.msk.f32.mxu1 %vm351_vm0, %v352_v4  ;;  %v116_v8 = vld [vmem:[%s472_s3 + $0x8] sm:$0xff]  ;;  %13 = vst [vmem:[#allocation2] sm:$0x1] %v12_v38 }
   0x3   :  { %v117_v9 = vld [vmem:[%s472_s3 + $0x10] sm:$0xff]  ;;  %v118_v10 = vld [vmem:[%s472_s3 + $0x18] sm:$0xff]  ;;  %v317_v11 = vpack.c.bf16 %v32_v6, %v31_v3  ;;  %v320_v12 = vpack.c.bf16 %v116_v8, %v115_v7  ;;  %v119_v14 = vld [vmem:[%s472_s3 + $0x20] sm:$0xff] }
   0x4   :  { %315 = vmatpush3.bf16.msra.mxu0 %v314_v5  ;;  %v323_v13 = vpack.c.bf16 %v118_v10, %v117_v9  ;;  %v120_v15 = vld [vmem:[%s472_s3 + $0x28] sm:$0xff]  ;;  %v28_v16 = vld [vmem:[%s473_s0] sm:$0xff]  ;;  %v121_v18 = vld [vmem:[%s472_s3 + $0x30] sm:$0xff] }
   0x5   :  { %316 = vmatprep.subr.bf16.mxu0 %v350_v0  ;;  %321 = vmatpush3.bf16.msra.mxu1 %v320_v12  ;;  %v326_v17 = vpack.c.bf16 %v120_v15, %v119_v14  ;;  %v122_v19 = vld [vmem:[%s472_s3 + $0x38] sm:$0xff]  ;;  %v123_v21 = vld [vmem:[%s472_s3 + $0x40] sm:$0xff]  ;;  %v124_v22 = vld [vmem:[%s472_s3 + $0x48] sm:$0xff] }
   0x6   :  { %322 = vmatprep.subr.bf16.mxu1 %v350_v0  ;;  %v329_v20 = vpack.c.bf16 %v122_v19, %v121_v18  ;;  %v332_v23 = vpack.c.bf16 %v124_v22, %v123_v21  ;;  %v125_v24 = vld [vmem:[%s472_s3 + $0x50] sm:$0xff]  ;;  %v126_v25 = vld [vmem:[%s472_s3 + $0x58] sm:$0xff]  ;;  %v127_v27 = vld [vmem:[%s472_s3 + $0x60] sm:$0xff] }
   0x7   :  { %v335_v26 = vpack.c.bf16 %v126_v25, %v125_v24  ;;  %v128_v28 = vld [vmem:[%s472_s3 + $0x68] sm:$0xff]  ;;  %v129_v30 = vld [vmem:[%s472_s3 + $0x70] sm:$0xff]  ;;  %v130_v31 = vld [vmem:[%s472_s3 + $0x78] sm:$0xff] }
   0x8   :  { %318 = vmatpush3.bf16.msra.mxu0 %v317_v11  ;;  %v338_v29 = vpack.c.bf16 %v128_v28, %v127_v27  ;;  %v341_v32 = vpack.c.bf16 %v130_v31, %v129_v30  ;;  %v240_v33 = vld [vmem:[%s474_s2] ss:$0 sm:$0xff] }
   0x9   :  { %324 = vmatpush3.bf16.msra.mxu1 %v323_v13  ;;  %v242_v39 = vld [vmem:[%s476_s4] ss:$0 sm:$0xff] }
   0xa   :  { %325 = vmatprep.subr.bf16.mxu1 %v350_v0  ;;  %v243_v43 = vld [vmem:[%s477_s5] ss:$0 sm:$0xff] }
   0xb   :  { %276 = vmatmul.mubr.msk.f32.vlgmr.msra.gmra.mrb[0].mxu0 %vm40_vm1, %v28_v16  ;;  %v244_v47 = vld [vmem:[#allocation2] ss:$0 sm:$0xff] }
   0xd   :  { %327 = vmatpush3.bf16.msra.mxu1 %v326_v17 }
   0xe   :  { %328 = vmatprep.subr.bf16.mxu1 %v350_v0 }
  0x11   :  { %330 = vmatpush3.bf16.msra.mxu1 %v329_v20 }
  0x12   :  { %331 = vmatprep.subr.bf16.mxu1 %v350_v0 }
  0x15   :  { %333 = vmatpush3.bf16.msra.mxu1 %v332_v23 }
  0x16   :  { %334 = vmatprep.subr.bf16.mxu1 %v350_v0 }
  0x19   :  { %336 = vmatpush3.bf16.msra.mxu1 %v335_v26 }
  0x1a   :  { %337 = vmatprep.subr.bf16.mxu1 %v350_v0 }
  0x1d   :  { %339 = vmatpush3.bf16.msra.mxu1 %v338_v29 }
  0x1e   :  { %340 = vmatprep.subr.bf16.mxu1 %v350_v0 }
  0x21   :  { %342 = vmatpush3.bf16.msra.mxu1 %v341_v32 }
  0xde   :  { %v110_v34 = vpop.f32.mrb[0].mxu0 }
  0xdf   :  { %v111_v35 = vadd.f32 %v240_v33, %v110_v34  ;;  %v277_v36 = vpop.f32.mrb[1].mxu0 }
  0xe1   :  { %v114_v37 = vmax.f32 %v111_v35, 0.0 }
  0xe3   :  { %311 = vmatmul.mubr.f32.vlgmr.msra.gmra.mrb[0].mxu1 %v114_v37 }
 0x1b6   :  { %v204_v40 = vpop.f32.mrb[0].mxu1 }
 0x1b7   :  { %v205_v41 = vadd.f32 %v242_v39, %v204_v40  ;;  %v312_v42 = vpop.f32.mrb[1].mxu1 }
 0x1b9   :  { %v208_v44 = vmax.f32 %v205_v41, 0.0 }
 0x1bb   :  { %v216_v45 = vmul.f32 %v243_v43, %v208_v44 }
 0x1bd   :  { %v218_v46 = vsel %vm217_vm2, %v216_v45, 0.0 }
 0x1be   :  { %219 = vadd.xlane.f32.xlu0 %v218_v46 }
 0x24b   :  { %v220_v48 = vpop.xlane.xlu0 %219 }
 0x24c   :  { %v228_v49 = vadd.f32 %v244_v47, %v220_v48 }
 0x24e   :  { %v229_v50 = vsub.f32 0.0, %v228_v49 }
 0x250   :  { %v230_v51 = vmul.f32 1.442695, %v229_v50 }
 0x252   :  { %346 = vpow2.f32 %v230_v51 }
 0x25c   :  { %v347_v52 = vpop.eup %346 }
 0x25d   :  { %v232_v53 = vadd.f32 1.0, %v347_v52 }
 0x25f   :  { %348 = vrcp.f32 %v232_v53 }
 0x269   :  { %v349_v54 = vpop.eup %348 }
 0x26a   :  { %235 = vst.msk [vmem:[%s478_s7] sm:$0xff] %vm234_vm3, %v349_v54 }

</bundles_post_ra>
